<compile_context>
chip_gen: v5e
topology: v5e:2x2
jax: 0.10.0
libtpu: 0.0.40
codegen_flags: <defaults>
</compile_context>

<pallas_src>
import jax
import jax.numpy as jnp
from jax.experimental import pallas as pl
from jax.experimental.pallas import tpu as pltpu

F32 = jnp.float32
BF16 = jnp.bfloat16
LEAKY_SLOPE = 0.01
BN_EPS = 1e-5

TM_MM = 512        # matmul row tile (K and N are taken whole)
TM_EW = 1024       # elementwise / reduction row tile
VMEM_LIMIT = 48 * 1024 * 1024   # safe for v5e/v6e/v7x


def _rup(x, m):
    return (x + m - 1) // m * m


def _cparams(sem):
    return pltpu.CompilerParams(dimension_semantics=sem,
                                vmem_limit_bytes=VMEM_LIMIT)


def _row_tile(M, row_bytes, tm_max, block_budget=8 << 20):
    """Row tile: >=2 blocks when possible (v7x megacore), %8-aligned, VMEM-capped.
    If the tile would cover the whole array, use the exact M (always legal)."""
    tm = min(tm_max, _rup(max((M + 1) // 2, 8), 8))
    cap = max(8, (block_budget // max(row_bytes, 4)) // 8 * 8)
    tm = min(tm, cap)
    return M if tm >= M else tm


# ----------------------------------------------------------------------------
# Pallas kernels
# ----------------------------------------------------------------------------

def _make_matmul_kernel(act):
    """act((X @ W) * scale + shift), full K and N per block (no accumulation axis)."""
    def kernel(x_ref, w_ref, scale_ref, shift_ref, o_ref):
        y = jnp.dot(x_ref[...], w_ref[...], preferred_element_type=jnp.float32)
        y = y * scale_ref[...] + shift_ref[...]
        if act == "relu":
            y = jnp.maximum(y, 0.0)
        elif act == "leaky":
            y = jnp.where(y >= 0.0, y, LEAKY_SLOPE * y)
        o_ref[...] = y.astype(o_ref.dtype)
    return kernel


def matmul_scale_shift_act(x, w, scale, shift, act="none"):
    """x:[M,K]  w:[K,N]  scale,shift:[N]  ->  act((x@w)*scale + shift) : [M,N].

    Inputs are cast to bf16 (f32 accumulation).  Only K is zero-padded (to a
    multiple of 128) when needed; M is handled with a ragged grid, N is the
    full output width (lane-dense streaming of A exactly once).
    """
    M, K = x.shape
    K2, N = w.shape
    assert K == K2
    Kp = _rup(K, 128)
    if Kp != K:
        # K padding must stay zero so the contraction is unaffected.
        x = jnp.pad(x, ((0, 0), (0, Kp - K)))
        w = jnp.pad(w, ((0, Kp - K), (0, 0)))
    xb = x.astype(BF16)
    wb = w.astype(BF16)
    sp = scale.reshape(1, N).astype(F32)
    bp = shift.reshape(1, N).astype(F32)

    tm = _row_tile(M, Kp * 2 + N * 4, TM_MM)
    out = pl.pallas_call(
        _make_matmul_kernel(act),
        out_shape=jax.ShapeDtypeStruct((M, N), F32),
        grid=(pl.cdiv(M, tm),),
        in_specs=[
            pl.BlockSpec((tm, Kp), lambda i: (i, 0)),
            pl.BlockSpec((Kp, N), lambda i: (0, 0)),
            pl.BlockSpec((1, N), lambda i: (0, 0)),
            pl.BlockSpec((1, N), lambda i: (0, 0)),
        ],
        out_specs=pl.BlockSpec((tm, N), lambda i: (i, 0)),
        compiler_params=_cparams(("parallel",)),
    )(xb, wb, sp, bp)
    return out


def _add_relu_kernel(a_ref, b_ref, o_ref):
    o_ref[...] = jnp.maximum(a_ref[...] + b_ref[...], 0.0)


def add_relu(a, b):
    """relu(a + b) for [M, C] operands (residual join)."""
    M, C = a.shape
    tm = _row_tile(M, C * 4, TM_EW)
    return pl.pallas_call(
        _add_relu_kernel,
        out_shape=jax.ShapeDtypeStruct((M, C), F32),
        grid=(pl.cdiv(M, tm),),
        in_specs=[pl.BlockSpec((tm, C), lambda i: (i, 0)),
                  pl.BlockSpec((tm, C), lambda i: (i, 0))],
        out_specs=pl.BlockSpec((tm, C), lambda i: (i, 0)),
        compiler_params=_cparams(("parallel",)),
    )(a.astype(F32), b.astype(F32))


def _lerp_rows_kernel(a_ref, b_ref, w_ref, o_ref):
    w = w_ref[...]                                  # (tm, 1)
    o_ref[...] = a_ref[...] * (1.0 - w) + b_ref[...] * w


def lerp_rows(a, b, w):
    """a*(1-w) + b*w with a per-row blend weight.  a,b:[M,NC]  w:[M,1]."""
    M, NC = a.shape
    tm = _row_tile(M, NC * 4, TM_EW)
    return pl.pallas_call(
        _lerp_rows_kernel,
        out_shape=jax.ShapeDtypeStruct((M, NC), F32),
        grid=(pl.cdiv(M, tm),),
        in_specs=[pl.BlockSpec((tm, NC), lambda i: (i, 0)),
                  pl.BlockSpec((tm, NC), lambda i: (i, 0)),
                  pl.BlockSpec((tm, 1), lambda i: (i, 0))],
        out_specs=pl.BlockSpec((tm, NC), lambda i: (i, 0)),
        compiler_params=_cparams(("parallel",)),
    )(a.astype(F32), b.astype(F32), w.astype(F32))


def _lerp_cols_kernel(a_ref, b_ref, w_ref, o_ref):
    w = w_ref[...]                                  # (1, NC)
    o_ref[...] = a_ref[...] * (1.0 - w) + b_ref[...] * w


def lerp_cols(a, b, w):
    """a*(1-w) + b*w with a per-column blend weight.  a,b:[M,NC]  w:[1,NC]."""
    M, NC = a.shape
    tm = _row_tile(M, NC * 4, TM_EW)
    return pl.pallas_call(
        _lerp_cols_kernel,
        out_shape=jax.ShapeDtypeStruct((M, NC), F32),
        grid=(pl.cdiv(M, tm),),
        in_specs=[pl.BlockSpec((tm, NC), lambda i: (i, 0)),
                  pl.BlockSpec((tm, NC), lambda i: (i, 0)),
                  pl.BlockSpec((1, NC), lambda i: (0, 0))],
        out_specs=pl.BlockSpec((tm, NC), lambda i: (i, 0)),
        compiler_params=_cparams(("parallel",)),
    )(a.astype(F32), b.astype(F32), w.astype(F32))


def _dw_conv_kernel(t_ref, w_ref, b_ref, o_ref):
    # t: (T, tm, C), w: (T, 1, C), b: (1, C) -> (tm, C)
    o_ref[...] = jnp.sum(t_ref[...] * w_ref[...], axis=0) + b_ref[...]


def dw_conv_taps(taps, w, b):
    """Depthwise conv as a tap reduction.  taps:[T,M,C] w:[T,C] b:[C] -> [M,C]."""
    T, M, C = taps.shape
    tm = _row_tile(M, T * C * 4, TM_EW)
    return pl.pallas_call(
        _dw_conv_kernel,
        out_shape=jax.ShapeDtypeStruct((M, C), F32),
        grid=(pl.cdiv(M, tm),),
        in_specs=[pl.BlockSpec((T, tm, C), lambda i: (0, i, 0)),
                  pl.BlockSpec((T, 1, C), lambda i: (0, 0, 0)),
                  pl.BlockSpec((1, C), lambda i: (0, 0))],
        out_specs=pl.BlockSpec((tm, C), lambda i: (i, 0)),
        compiler_params=_cparams(("parallel",)),
    )(taps.astype(F32), w.reshape(T, 1, C).astype(F32), b.reshape(1, C).astype(F32))


def _maxpool_kernel(t_ref, o_ref):
    o_ref[...] = jnp.max(t_ref[...], axis=0)


def max_taps(taps):
    """Max over taps.  taps:[T,M,C] -> [M,C]."""
    T, M, C = taps.shape
    tm = _row_tile(M, T * C * 4, TM_EW)
    return pl.pallas_call(
        _maxpool_kernel,
        out_shape=jax.ShapeDtypeStruct((M, C), F32),
        grid=(pl.cdiv(M, tm),),
        in_specs=[pl.BlockSpec((T, tm, C), lambda i: (0, i, 0))],
        out_specs=pl.BlockSpec((tm, C), lambda i: (i, 0)),
        compiler_params=_cparams(("parallel",)),
    )(taps.astype(F32))


def _dw_transpose_kernel(x_ref, w_ref, b_ref, o_ref):
    # x: (tm, C), w: (T, 1, C), b: (1, C) -> o: (T, tm, C)
    o_ref[...] = x_ref[...] * w_ref[...] + b_ref[...]


def dw_transpose_taps(x2d, w, b):
    """Depthwise ConvTranspose (stride == kernel, pad 0) as tap expansion.
    x2d:[M,C]  w:[T,C]  b:[C]  ->  taps [T,M,C]."""
    M, C = x2d.shape
    T = w.shape[0]
    tm = _row_tile(M, T * C * 4, TM_EW)
    return pl.pallas_call(
        _dw_transpose_kernel,
        out_shape=jax.ShapeDtypeStruct((T, M, C), F32),
        grid=(pl.cdiv(M, tm),),
        in_specs=[pl.BlockSpec((tm, C), lambda i: (i, 0)),
                  pl.BlockSpec((T, 1, C), lambda i: (0, 0, 0)),
                  pl.BlockSpec((1, C), lambda i: (0, 0))],
        out_specs=pl.BlockSpec((T, tm, C), lambda i: (0, i, 0)),
        compiler_params=_cparams(("parallel",)),
    )(x2d.astype(F32), w.reshape(T, 1, C).astype(F32), b.reshape(1, C).astype(F32))


def _make_dwt_final_kernel(kh):
    def kernel(x_ref, w_ref, b_ref, o_ref):
        # x: (1, TH, Wout), w: (1, kh, Wout), b: (1, 1, 1), o: (1, TH, kh*Wout)
        x = x_ref[0]                          # (TH, Wout)
        bias = b_ref[0]                       # (1, 1)
        wout = x.shape[-1]
        for a in range(kh):                   # static unroll
            wa = w_ref[0, a:a + 1, :]         # (1, Wout)
            o_ref[0, :, a * wout:(a + 1) * wout] = x * wa + bias
    return kernel


def dw_transpose_final_nchw(x_nhwc, w, b, kh, kw):
    """ConvTranspose2d(C,C,(kh,kw),(kh,kw),0,groups=C), emitting NCHW output with
    W_out on the lane axis (lane-dense stores, fused layout transpose)."""
    N, H, W, C = x_nhwc.shape
    Wout = W * kw
    NC = N * C
    x_flat = jnp.transpose(x_nhwc, (0, 3, 1, 2)).reshape(NC, H, W)
    xrep = jnp.repeat(x_flat, kw, axis=-1).astype(F32)            # [NC, H, W*kw]
    wt = jnp.transpose(w.reshape(kh, kw, C), (2, 0, 1))           # [C, kh, kw]
    wtile = jnp.tile(wt, (N, 1, W)).astype(F32)                   # [NC, kh, W*kw]
    btile = jnp.tile(b.reshape(C, 1, 1), (N, 1, 1)).astype(F32)   # [NC, 1, 1]

    TH = min(H, 128)
    out = pl.pallas_call(
        _make_dwt_final_kernel(kh),
        out_shape=jax.ShapeDtypeStruct((NC, H, kh * Wout), F32),
        grid=(NC, pl.cdiv(H, TH)),
        in_specs=[pl.BlockSpec((1, TH, Wout), lambda nc, hb: (nc, hb, 0)),
                  pl.BlockSpec((1, kh, Wout), lambda nc, hb: (nc, 0, 0)),
                  pl.BlockSpec((1, 1, 1), lambda nc, hb: (nc, 0, 0))],
        out_specs=pl.BlockSpec((1, TH, kh * Wout), lambda nc, hb: (nc, hb, 0)),
        compiler_params=_cparams(("parallel", "parallel")),
    )(xrep, wtile, btile)
    # [NC, H, kh*Wout] -> [N, C, H*kh, Wout] is a pure (free) reshape.
    return out.reshape(N, C, H * kh, Wout)


# ----------------------------------------------------------------------------
# JAX glue: im2col, layer helpers (all heavy math goes through the kernels)
# ----------------------------------------------------------------------------

def extract_patches(x, kh, kw, sh, sw, ph, pw, pad_val=0.0):
    """x:[N,H,W,C] -> taps [kh*kw, N, Ho, Wo, C]."""
    N, H, W, C = x.shape
    Ho = (H + 2 * ph - kh) // sh + 1
    Wo = (W + 2 * pw - kw) // sw + 1
    xp = jnp.pad(x, ((0, 0), (ph, ph), (pw, pw), (0, 0)), constant_values=pad_val)
    rows = []
    for a in range(kh):
        for b in range(kw):
            rows.append(xp[:, a:a + sh * (Ho - 1) + 1:sh,
                           b:b + sw * (Wo - 1) + 1:sw, :])
    return jnp.stack(rows, axis=0), Ho, Wo


def bn_fold(bn, conv_bias=None):
    scale = bn["gamma"] / jnp.sqrt(bn["var"] + BN_EPS)
    shift = bn["beta"] - bn["mean"] * scale
    if conv_bias is not None:
        shift = shift + conv_bias * scale
    return scale, shift


def conv_bn_act(x, w, bn, stride, pad, act, conv_bias=None):
    """Standard KxK conv (im2col) fused with BN(eval) + activation (bf16 patches)."""
    kh, kw, cin, cout = w.shape
    xb = x.astype(BF16)      # im2col is materialized in bf16 (half the HBM bytes)
    taps, Ho, Wo = extract_patches(xb, kh, kw, stride[0], stride[1], pad[0], pad[1])
    N = x.shape[0]
    patches = jnp.transpose(taps, (1, 2, 3, 0, 4)).reshape(N * Ho * Wo, kh * kw * cin)
    scale, shift = bn_fold(bn, conv_bias)
    y = matmul_scale_shift_act(patches, w.reshape(kh * kw * cin, cout),
                               scale, shift, act)
    return y.reshape(N, Ho, Wo, cout)


def pointwise_bn_act(x, w, bias, bn, act):
    """1x1 conv (or 1x1 transposed conv) + BN(eval) + activation."""
    N, H, W, Cin = x.shape
    Cout = w.shape[1]
    scale, shift = bn_fold(bn, conv_bias=bias)
    y = matmul_scale_shift_act(x.reshape(-1, Cin), w, scale, shift, act)
    return y.reshape(N, H, W, Cout)


def depthwise_conv(x, w, b, kernel, stride, pad):
    kh, kw = kernel
    taps, Ho, Wo = extract_patches(x, kh, kw, stride[0], stride[1], pad[0], pad[1])
    T, N, _, _, C = taps.shape
    y = dw_conv_taps(taps.reshape(T, N * Ho * Wo, C), w.reshape(kh * kw, C), b)
    return y.reshape(N, Ho, Wo, C)


def maxpool2d(x, kernel=3, stride=2, pad=1):
    taps, Ho, Wo = extract_patches(x, kernel, kernel, stride, stride, pad, pad,
                                   pad_val=-jnp.inf)
    T, N, _, _, C = taps.shape
    y = max_taps(taps.reshape(T, N * Ho * Wo, C))
    return y.reshape(N, Ho, Wo, C)


def depthwise_transpose(x, w, b, kh, kw):
    """ConvTranspose2d(C,C,(kh,kw),(kh,kw),0,groups=C), NHWC output."""
    N, H, W, C = x.shape
    taps = dw_transpose_taps(x.reshape(N * H * W, C), w.reshape(kh * kw, C), b)
    out = taps.reshape(kh, kw, N, H, W, C)
    out = jnp.transpose(out, (2, 3, 0, 4, 1, 5)).reshape(N, H * kh, W * kw, C)
    return out


def _interp_indices(in_size, out_size):
    # PyTorch bilinear, align_corners=False
    od = jnp.arange(out_size, dtype=F32)
    src = (od + 0.5) * (in_size / out_size) - 0.5
    src = jnp.maximum(src, 0.0)
    i0 = jnp.minimum(jnp.floor(src).astype(jnp.int32), in_size - 1)
    i1 = jnp.minimum(i0 + 1, in_size - 1)
    return i0, i1, src - i0.astype(F32)


def bilinear_resize(x, out_h, out_w):
    """F.interpolate(x, (out_h,out_w), mode='bilinear', align_corners=False).
    Lane-dense: H-pass blends [N*out_h, W*C] rows, W-pass blends
    [N*out_h, out_w*C] with a per-column weight row."""
    N, H, W, C = x.shape
    i0, i1, wh = _interp_indices(H, out_h)
    a = jnp.take(x, i0, axis=1).reshape(N * out_h, W * C)
    b = jnp.take(x, i1, axis=1).reshape(N * out_h, W * C)
    wrow = jnp.tile(wh, (N,)).reshape(N * out_h, 1)
    xh = lerp_rows(a, b, wrow).reshape(N, out_h, W, C)

    j0, j1, ww = _interp_indices(W, out_w)
    a = jnp.take(xh, j0, axis=2).reshape(N * out_h, out_w * C)
    b = jnp.take(xh, j1, axis=2).reshape(N * out_h, out_w * C)
    wcol = jnp.repeat(ww, C).reshape(1, out_w * C)
    out = lerp_cols(a, b, wcol).reshape(N, out_h, out_w, C)
    return out


# ----------------------------------------------------------------------------
# Model: parameters + forward
# ----------------------------------------------------------------------------

RESNET_CFG = [(64, 1), (128, 2), (256, 2), (512, 2)]   # (channels, first-block stride)


class ParamRNG:
    def __init__(self, seed):
        self.key = jax.random.PRNGKey(seed)

    def normal(self, shape, scale=1.0):
        self.key, sub = jax.random.split(self.key)
        return scale * jax.random.normal(sub, shape, dtype=F32)


def init_bn(rng, c):
    return {"gamma": 1.0 + rng.normal((c,), 0.05),
            "beta": rng.normal((c,), 0.05),
            "mean": rng.normal((c,), 0.05),
            "var": 1.0 + jnp.abs(rng.normal((c,), 0.05))}


def init_params(rng):
    params = {}
    # --- preprocess: conv_bn_LRelu(3, 3, (4,4), (2,4), (1,1)) (groups=3 dw + 1x1) ---
    params["pre"] = {
        "dw_w": rng.normal((4, 4, 3), (2.0 / 16) ** 0.5),
        "dw_b": rng.normal((3,), 0.01),
        "pw_w": rng.normal((3, 3), (2.0 / 3) ** 0.5),
        "pw_b": rng.normal((3,), 0.01),
        "bn": init_bn(rng, 3),
    }
    # --- encoder: ResNet18 feature trunk (children()[:-2]), synthetic weights ---
    enc = {"conv1_w": rng.normal((7, 7, 3, 64), (2.0 / (49 * 3)) ** 0.5),
           "bn1": init_bn(rng, 64),
           "layers": []}
    cin = 64
    for cout, stride in RESNET_CFG:
        layer = []
        for bi in range(2):
            s = stride if bi == 0 else 1
            cb_in = cin if bi == 0 else cout
            blk = {
                "w1": rng.normal((3, 3, cb_in, cout), (2.0 / (9 * cb_in)) ** 0.5),
                "bn1": init_bn(rng, cout),
                "w2": rng.normal((3, 3, cout, cout), (2.0 / (9 * cout)) ** 0.5),
                "bn2": init_bn(rng, cout),
            }
            if s != 1 or cb_in != cout:
                blk["wd"] = rng.normal((1, 1, cb_in, cout), (2.0 / cb_in) ** 0.5)
                blk["bnd"] = init_bn(rng, cout)
            layer.append(blk)
        enc["layers"].append(layer)
        cin = cout
    params["enc"] = enc
    # --- decoder ---
    params["dec"] = {
        "dw1_w": rng.normal((4, 4, 512), 0.25), "dw1_b": rng.normal((512,), 0.01),
        "pw1_w": rng.normal((512, 64), (2.0 / 512) ** 0.5),
        "pw1_b": rng.normal((64,), 0.01), "bn1": init_bn(rng, 64),
        "dw2_w": rng.normal((4, 4, 64), 0.25), "dw2_b": rng.normal((64,), 0.01),
        "pw2_w": rng.normal((64, 34), (2.0 / 64) ** 0.5),
        "pw2_b": rng.normal((34,), 0.01), "bn2": init_bn(rng, 34),
        "dw3_w": rng.normal((4, 8, 34), 0.25), "dw3_b": rng.normal((34,), 0.01),
    }
    return params


def basic_block(x, blk, stride):
    out = conv_bn_act(x, blk["w1"], blk["bn1"], (stride, stride), (1, 1), "relu")
    out = conv_bn_act(out, blk["w2"], blk["bn2"], (1, 1), (1, 1), "none")
    if "wd" in blk:
        identity = conv_bn_act(x, blk["wd"], blk["bnd"], (stride, stride), (0, 0), "none")
    else:
        identity = x
    N, H, W, C = out.shape
    y = add_relu(out.reshape(-1, C), identity.reshape(-1, C))
    return y.reshape(N, H, W, C)


def resnet18_features(enc, x):
    x = conv_bn_act(x, enc["conv1_w"], enc["bn1"], (2, 2), (3, 3), "relu")
    x = maxpool2d(x, 3, 2, 1)
    for (cout, stride), layer in zip(RESNET_CFG, enc["layers"]):
        for bi, blk in enumerate(layer):
            x = basic_block(x, blk, stride if bi == 0 else 1)
    return x  # [N, 7, 7, 512] for 224x224 input


@jax.jit
def resnet18_seg_forward(params, x_nchw):
    x = jnp.transpose(x_nchw.astype(F32), (0, 2, 3, 1))        # NCHW -> NHWC
    # preprocess: depthwise 4x4 (stride 2,4, pad 1) + 1x1 + BN + LeakyReLU
    pre = params["pre"]
    x = depthwise_conv(x, pre["dw_w"], pre["dw_b"], (4, 4), (2, 4), (1, 1))
    x = pointwise_bn_act(x, pre["pw_w"], pre["pw_b"], pre["bn"], "leaky")
    x = bilinear_resize(x, 224, 224)
    x = resnet18_features(params["enc"], x)
    x = bilinear_resize(x, 8, 8)
    # decoder
    dec = params["dec"]
    x = depthwise_transpose(x, dec["dw1_w"], dec["dw1_b"], 4, 4)          # 8 -> 32
    x = pointwise_bn_act(x, dec["pw1_w"], dec["pw1_b"], dec["bn1"], "leaky")
    x = depthwise_transpose(x, dec["dw2_w"], dec["dw2_b"], 4, 4)          # 32 -> 128
    x = pointwise_bn_act(x, dec["pw2_w"], dec["pw2_b"], dec["bn2"], "leaky")
    # final depthwise transpose writes NCHW directly (lane-dense W_out=1024)
    x = dw_transpose_final_nchw(x, dec["dw3_w"], dec["dw3_b"], 4, 8)      # -> 512x1024
    return x                                                              # NCHW


# ----------------------------------------------------------------------------
# main
# ----------------------------------------------------------------------------

if __name__ == "__main__":
    # --- self-check 1: fused matmul kernel (bf16 inputs -> loose tolerance) ---
    ck = jax.random.PRNGKey(1)
    k1, k2, k3, k4 = jax.random.split(ck, 4)
    a = jax.random.normal(k1, (70, 50), F32)
    w = jax.random.normal(k2, (50, 30), F32)
    sc = jax.random.normal(k3, (30,), F32)
    sh = jax.random.normal(k4, (30,), F32)
    got = matmul_scale_shift_act(a, w, sc, sh, "relu")
    ref = jnp.maximum(a @ w * sc + sh, 0.0)
    assert got.shape == ref.shape
    assert bool(jnp.allclose(got, ref, atol=0.5, rtol=0.05))

    # --- self-check 2: final NCHW depthwise-transpose kernel vs taps path ---
    kk = jax.random.split(jax.random.PRNGKey(2), 3)
    xt = jax.random.normal(kk[0], (1, 2, 2, 3), F32)        # N,H,W,C
    wt = jax.random.normal(kk[1], (2, 2, 3), F32)           # kh,kw,C
    bt = jax.random.normal(kk[2], (3,), F32)
    got2 = dw_transpose_final_nchw(xt, wt, bt, 2, 2)
    ref2 = jnp.transpose(depthwise_transpose(xt, wt, bt, 2, 2), (0, 3, 1, 2))
    assert bool(jnp.allclose(got2, ref2, atol=1e-5, rtol=1e-5))

    # --- full model ---
    rng = ParamRNG(0)
    params = init_params(rng)

    x = jax.random.normal(jax.random.PRNGKey(0), (2, 3, 32, 32), dtype=F32)
    out = resnet18_seg_forward(params, x)
    out = jax.block_until_ready(out)

    assert out.shape == (2, 34, 512, 1024), out.shape
    assert bool(jnp.all(jnp.isfinite(out)))
    print("KERNEL_OK")
</pallas_src>

<mosaic_0001>
module attributes {stable_mosaic.version = 11 : i64} {
  func.func @kernel(%arg0: i32, %arg1: memref<40x128xbf16, #tpu.memory_space<vmem>>, %arg2: memref<128x30xbf16, #tpu.memory_space<vmem>>, %arg3: memref<1x30xf32, #tpu.memory_space<vmem>>, %arg4: memref<1x30xf32, #tpu.memory_space<vmem>>, %arg5: memref<40x30xf32, #tpu.memory_space<vmem>>) attributes {dimension_semantics = [#tpu.dimension_semantics<parallel>], iteration_bounds = array<i64: 2>, scalar_prefetch = 0 : i64, scratch_operands = 0 : i64, tpu.core_type = #tpu.core_type<tc>, window_params = [{transform_indices = @transform_0, window_bounds = array<i64: 40, 128>}, {pipeline_mode = #tpu.pipeline_mode<synchronous>, transform_indices = @transform_1, window_bounds = array<i64: 128, 30>}, {pipeline_mode = #tpu.pipeline_mode<synchronous>, transform_indices = @transform_2, window_bounds = array<i64: 1, 30>}, {pipeline_mode = #tpu.pipeline_mode<synchronous>, transform_indices = @transform_3, window_bounds = array<i64: 1, 30>}, {transform_indices = @transform_4, window_bounds = array<i64: 40, 30>}]} {
    %c0 = arith.constant 0 : index
    %c0_0 = arith.constant 0 : index
    %0 = vector.load %arg1[%c0, %c0_0] : memref<40x128xbf16, #tpu.memory_space<vmem>>, vector<40x128xbf16>
    %c0_1 = arith.constant 0 : index
    %c0_2 = arith.constant 0 : index
    %1 = vector.load %arg2[%c0_1, %c0_2] : memref<128x30xbf16, #tpu.memory_space<vmem>>, vector<128x30xbf16>
    %cst = arith.constant dense<0.000000e+00> : vector<40x30xf32>
    %2 = tpu.matmul %0, %1, %cst {dimension_numbers = #tpu.dot_dimension_numbers<[1], [0], [0], [1], [0, 0, 1, 1], [], []>} : vector<40x128xbf16>, vector<128x30xbf16>, vector<40x30xf32> -> vector<40x30xf32>
    %c0_3 = arith.constant 0 : index
    %c0_4 = arith.constant 0 : index
    %3 = vector.load %arg3[%c0_3, %c0_4] : memref<1x30xf32, #tpu.memory_space<vmem>>, vector<1x30xf32>
    %4 = vector.broadcast %3 : vector<1x30xf32> to vector<40x30xf32>
    %5 = arith.mulf %2, %4 : vector<40x30xf32>
    %c0_5 = arith.constant 0 : index
    %c0_6 = arith.constant 0 : index
    %6 = vector.load %arg4[%c0_5, %c0_6] : memref<1x30xf32, #tpu.memory_space<vmem>>, vector<1x30xf32>
    %7 = vector.broadcast %6 : vector<1x30xf32> to vector<40x30xf32>
    %8 = arith.addf %5, %7 : vector<40x30xf32>
    %cst_7 = arith.constant 0.000000e+00 : f32
    %9 = vector.broadcast %cst_7 : f32 to vector<40x30xf32>
    %10 = arith.maximumf %8, %9 : vector<40x30xf32>
    %c0_8 = arith.constant 0 : index
    %c0_9 = arith.constant 0 : index
    %11 = vector.load %arg5[%c0_8, %c0_9] : memref<40x30xf32, #tpu.memory_space<vmem>>, vector<40x30xf32>
    tpu.vector_store %arg5[%c0_8, %c0_9], %10 {strides = array<i32>} : memref<40x30xf32, #tpu.memory_space<vmem>>, vector<40x30xf32>,
    return
  }
  func.func @transform_0(%arg0: i32) -> (i32, i32) {
    %c0_i32 = arith.constant 0 : i32
    %c0_i32_0 = arith.constant 0 : i32
    return %arg0, %c0_i32 : i32, i32
  }
  func.func @transform_1(%arg0: i32) -> (i32, i32) {
    %c0_i32 = arith.constant 0 : i32
    %c0_i32_0 = arith.constant 0 : i32
    %c0_i32_1 = arith.constant 0 : i32
    return %c0_i32, %c0_i32_0 : i32, i32
  }
  func.func @transform_2(%arg0: i32) -> (i32, i32) {
    %c0_i32 = arith.constant 0 : i32
    %c0_i32_0 = arith.constant 0 : i32
    %c0_i32_1 = arith.constant 0 : i32
    return %c0_i32, %c0_i32_0 : i32, i32
  }
  func.func @transform_3(%arg0: i32) -> (i32, i32) {
    %c0_i32 = arith.constant 0 : i32
    %c0_i32_0 = arith.constant 0 : i32
    %c0_i32_1 = arith.constant 0 : i32
    return %c0_i32, %c0_i32_0 : i32, i32
  }
  func.func @transform_4(%arg0: i32) -> (i32, i32) {
    %c0_i32 = arith.constant 0 : i32
    %c0_i32_0 = arith.constant 0 : i32
    return %arg0, %c0_i32 : i32, i32
  }
}

</mosaic_0001>

<bundles_post_ra>
// kernel: tpu_custom_call.1
= control target key start
LH: loop header
LB: loop body
LE: loop exit
PB: predicated region body
PF: predicated region fallthrough
CT: control target
= control target key end

     0   :  { %s885_s15 = smov 0   ;;  %s887_s16 = smov 0   ;;  %s1025_s0 = inlined_call_operand.vmem [shape: bf16[70,128], index: 0, kind: input, shape index: {}]   ;;  %s1026_s1 = inlined_call_operand.vmem [shape: bf16[128,30], index: 1, kind: input, shape index: {}]   ;;  %s1027_s2 = inlined_call_operand.vmem [shape: f32[1,30], index: 2, kind: input, shape index: {}]   ;;  %s1028_s3 = inlined_call_operand.vmem [shape: f32[1,30], index: 3, kind: input, shape index: {}]   ;;  %s1029_s4 = inlined_call_operand.vmem [shape: f32[70,30], index: 4, kind: output, shape index: {}]  }
   0x1   :  { %s889_s17 = smov 0  }
   0x2 LB: > { %s898_s18 = sadd.s32 4294967295, %s826_s17   ;;  %s900_s19 = sadd.s32 1, %s826_s17   ;;  %s826_s17 = sphi %s889_s17, %s1036_s17   ;;  %s822_s16 = sphi %s887_s16, %s1035_s16   ;;  %s818_s15 = sphi %s885_s15, %s1034_s15  }
   0x3   : > { %s107_s20 = ssub.s32 %s826_s17, %s900_s19  ;;  %s110_s21 = sadd.s32 1, %s822_s16 }
   0x4   : > { %p108_p0 = scmp.eq.s32.totalorder %s107_s20, 0  ;;  %p120_p1 = scmp.ne.s32.totalorder %s822_s16, %s818_s15 }
   0x5   : > { %p121_p2 = scmp.eq.s32.totalorder %s898_s18, 1  ;;  %p593_p3 = scmp.ge.s32.totalorder %s826_s17, 1 }
   0x6   : > { %s908_s22 = scalar_select %p108_p0, %s822_s16, %s110_s21  }
   0x7   : > { %p910_p4 = por %p121_p2, %p120_p1  ;;  %p171_p5 = scmp.lt.s32.totalorder %s826_s17, 3 }
   0x9   : > { %p172_p6 = pnand %p593_p3, %p171_p5 }
   0xa   : > { %s921_s28 = smul.u32 (!%p172_p6), 5, %s898_s18  ;;  %s197_s26 = sand.u32 (!%p172_p6), 1, %s818_s15  }
   0xb   : > { %175 = sbr.rel (%p172_p6) target bundleno = 244 (0xf4), region = 36 }
   0xc   : > { %p205_p7 = scmp.lt.s32.totalorder (!%p172_p6), %s921_s28, 8  ;;  %s674_s6 = smul.u32 (!%p172_p6), 40, %s197_s26 }
  0x10   : > { %v656_v0 = vld [vmem:[%s1026_s1 + $0x38] sm:$0xff]  ;;  %v655_v1 = vld [vmem:[%s1026_s1 + $0x30] sm:$0xff]  ;;  %v654_v2 = vld [vmem:[%s1026_s1 + $0x28] sm:$0xff]  ;;  %s206_s7 = scalar_select %p205_p7, %s921_s28, 8  ;;  %vm350_vm0 = vcmask 244736  }
  0x11   : > { %304 = vmatpush.bf16.msra.mxu0 %v656_v0  ;;  %658 = vmatpush.bf16.msra.mxu1 %v656_v0  ;;  %v653_v3 = vld [vmem:[%s1026_s1 + $0x20] sm:$0xff]  ;;  %v652_v4 = vld [vmem:[%s1026_s1 + $0x18] sm:$0xff]  ;;  %v651_v5 = vld [vmem:[%s1026_s1 + $0x10] sm:$0xff]  ;;  %s364_s15 = ssub.s32 (%p910_p4), 9, %s921_s28  ;;  %s657_s8 = smul.u32 (%p910_p4), 40, %s898_s18 }
  0x12   : > { %659 = vmatpush.bf16.msra.mxu2 %v656_v0  ;;  %s594_s10 = sshll.u32 %s206_s7, 2  ;;  %v650_v6 = vld [vmem:[%s1026_s1 + $0x8] sm:$0xff]  ;;  %v649_v8 = vld [vmem:[%s1026_s1] sm:$0xff]  ;;  %s953_s7 = scalar_lea.vmem [#allocation2], %s674_s6  }
  0x13   : > { %s208_s17 = scalar_lea.vmem %s1025_s0, %s594_s10  ;;  %v764_v13 = vld [vmem:[%s1027_s2] ss:$0 sm:$0xff]  ;;  %p365_p8 = scmp.lt.s32.totalorder (%p910_p4), %s364_s15, 5 }
  0x14   : > { %v223_v7 = vld [vmem:[%s208_s17 + $0x10] sm:$0xf]  ;;  %v647_v10 = vld [vmem:[%s208_s17] sm:$0xff]  ;;  %v648_v11 = vld [vmem:[%s208_s17 + $0x8] sm:$0xff]  ;;  %s972_s11 = scalar_lea.vmem (%p910_p4), %s1029_s4, %s657_s8  }
  0x15   : > { %305 = vmatpush.bf16.msra.mxu0 %v655_v1  ;;  %660 = vmatpush.bf16.msra.mxu1 %v655_v1  ;;  %v249_v9 = vunpack.c.l.b16 %v223_v7  ;;  %v765_v14 = vld [vmem:[%s1028_s3] ss:$0 sm:$0xff] }
  0x16   : > { %661 = vmatpush.bf16.msra.mxu2 %v655_v1 }
  0x17   : > { %v252_v12 = vpack.c.b16 %v249_v9, %v249_v9 }
  0x19   : > { %306 = vmatpush.bf16.msra.mxu0 %v654_v2  ;;  %662 = vmatpush.bf16.msra.mxu1 %v654_v2 }
  0x1a   : > { %663 = vmatpush.bf16.msra.mxu2 %v654_v2 }
  0x1d   : > { %307 = vmatpush.bf16.msra.mxu0 %v653_v3  ;;  %664 = vmatpush.bf16.msra.mxu1 %v653_v3 }
  0x1e   : > { %665 = vmatpush.bf16.msra.mxu2 %v653_v3 }
  0x21   : > { %308 = vmatpush.bf16.msra.mxu0 %v652_v4  ;;  %666 = vmatpush.bf16.msra.mxu1 %v652_v4 }
  0x22   : > { %667 = vmatpush.bf16.msra.mxu2 %v652_v4 }
  0x25   : > { %309 = vmatpush.bf16.msra.mxu0 %v651_v5  ;;  %668 = vmatpush.bf16.msra.mxu1 %v651_v5 }
  0x26   : > { %669 = vmatpush.bf16.msra.mxu2 %v651_v5 }
  0x29   : > { %310 = vmatpush.bf16.msra.mxu0 %v650_v6  ;;  %670 = vmatpush.bf16.msra.mxu1 %v650_v6 }
  0x2a   : > { %671 = vmatpush.bf16.msra.mxu2 %v650_v6 }
  0x2d   : > { %311 = vmatpush.bf16.msra.mxu0 %v649_v8  ;;  %672 = vmatpush.bf16.msra.mxu1 %v649_v8 }
  0x2e   : > { %673 = vmatpush.bf16.msra.mxu2 %v649_v8 }
  0x30   : > { %312 = vmatmul.bf16.vlgmr.msra.gmra.mxu0 %v647_v10  ;;  %317 = vmatmul.bf16.vlgmr.msra.gmra.mxu1 %v648_v11 }
  0x31   : > { %322 = vmatmul.bf16.vlgmr.msra.gmra.mxu2 %v252_v12 }
  0xad   : > { %v313_v15 = vpop.f32.mrf.mxu0  ;;  %v318_v16 = vpop.f32.mrf.mxu1 }
  0xae   : > { %v331_v17 = vmul.f32 %v764_v13, %v313_v15  ;;  %v333_v18 = vmul.f32 %v764_v13, %v318_v16 }
  0xb0   : > { %v340_v19 = vadd.f32 %v765_v14, %v331_v17  ;;  %v342_v20 = vadd.f32 %v765_v14, %v333_v18 }
  0xb2   : > { %v345_v21 = vmax.f32 %v340_v19, 0.0  ;;  %v347_v22 = vmax.f32 %v342_v20, 0.0 }
  0xb4   : > { %351 = vst.msk [vmem:[%s953_s7] sm:$0xff] %vm350_vm0, %v345_v21  ;;  %v323_v23 = vpop.f32.mrf.mxu2 }
  0xb5   : > { %353 = vst.msk [vmem:[%s953_s7 + $0x10] sm:$0xff] %vm350_vm0, %v347_v22  ;;  %v335_v24 = vmul.f32 %v764_v13, %v323_v23  ;;  %v315_v25 = vpop.f32.mrf.mxu0  ;;  %v320_v26 = vpop.f32.mrf.mxu1 }
  0xb6   : > { %v332_v27 = vmul.f32 %v764_v13, %v315_v25  ;;  %v334_v28 = vmul.f32 %v764_v13, %v320_v26 }
  0xb7   : > { %v344_v29 = vadd.f32 %v765_v14, %v335_v24 }
  0xb8   : > { %v341_v30 = vadd.f32 %v765_v14, %v332_v27  ;;  %v343_v31 = vadd.f32 %v765_v14, %v334_v28 }
  0xb9   : > { %v349_v32 = vmax.f32 %v344_v29, 0.0  ;;  %362 = sbr.rel (!%p910_p4) target bundleno = 244 (0xf4), region = 40 }
  0xba   : > { %v346_v33 = vmax.f32 %v341_v30, 0.0  ;;  %v348_v34 = vmax.f32 %v343_v31, 0.0 }
  0xbb   : > { %355 = vst.msk [vmem:[%s953_s7 + $0x20] sm:$0xff] %vm350_vm0, %v349_v32 }
  0xbc   : > { %352 = vst.msk [vmem:[%s953_s7 + $0x8] sm:$0xff] %vm350_vm0, %v346_v33  ;;  %v325_v35 = vpop.f32.mrf.mxu2 }
  0xbd   : > { %354 = vst.msk [vmem:[%s953_s7 + $0x18] sm:$0xff] %vm350_vm0, %v348_v34 }
  0xbe   : > { %s1038_s15 = smov (!%p365_p8, %s364_s15), 5 }
  0xbf   : > { %s635_s12 = sshll.u32 %s1038_s15, 3 }
  0xc0   : > { %p638_p9 = scmp.eq.s32.totalorder %s635_s12, 0 }
  0xc1   : > { %766 = sdivrem.u32 (!%p638_p9), %s1038_s15, 5 }
  0xc2   : > { %373 = sbr.rel (%p638_p9) target bundleno = 244 (0xf4), region = 44 }
  0xca   : > { %s978_s23 = spop.drf %766 }
  0xcb   : > { %s768_s13 = spop.drf %766  ;;  %p639_p10 = scmp.le.s32.totalorder %s978_s23, 0 }
  0xcc   : > { %s1031_s18 = smov (!%p639_p10), %s972_s11  ;;  %s1032_s28 = smov (!%p639_p10), %s953_s7 }
  0xcd   : > { %546 = sbr.rel (%p639_p10) target bundleno = 218 (0xda), region = 120  ;;  %s987_s14 = smov (!%p639_p10), 0  }
  0xce   : > { %s989_s17 = smov (!%p639_p10), 0  }
  0xd2 LB: >> { %v446_v36 = vld [vmem:[%s834_s28] sm:$0xff]  ;;  %v448_v37 = vld [vmem:[%s834_s28 + $0x8] sm:$0xff]  ;;  %v450_v38 = vld [vmem:[%s834_s28 + $0x10] sm:$0xff]  ;;  %s456_s20 = sadd.s32 1, %s838_s14  ;;  %s440_s17 = sadd.s32 1, %s842_s17   ;;  %s842_s17 = sphi %s989_s17, %s440_s17   ;;  %s838_s14 = sphi %s987_s14, %s1033_s14   ;;  %s834_s28 = sphi %s1032_s28, %s461_s28   ;;  %s830_s18 = sphi %s1031_s18, %s462_s18  }
  0xd3   : >> { %447 = vst [vmem:[%s830_s18] sm:$0xff] %v446_v36  ;;  %v452_v39 = vld [vmem:[%s834_s28 + $0x18] sm:$0xff]  ;;  %p457_p11 = scmp.ge.s32.totalorder %s456_s20, %s978_s23  ;;  %v454_v40 = vld [vmem:[%s834_s28 + $0x20] sm:$0xff]  ;;  %p439_p12 = scmp.ge.s32.totalorder %s440_s17, %s978_s23 }
  0xd4   : >> { %449 = vst [vmem:[%s830_s18 + $0x8] sm:$0xff] %v448_v37 }
  0xd5   : >> { %451 = vst [vmem:[%s830_s18 + $0x10] sm:$0xff] %v450_v38  ;;  %s1040_s20 = smov (%p457_p11, %s456_s20), 0  ;;  %442 = sbr.rel (!%p439_p12) target bundleno = 210 (0xd2), region = 126 }
  0xd6   : >> { %453 = vst [vmem:[%s830_s18 + $0x18] sm:$0xff] %v452_v39  ;;  %s459_s21 = smul.u32 40, %s1040_s20  ;;  %s1033_s14 = smov %s1040_s20 }
  0xd7   : >> { %455 = vst [vmem:[%s830_s18 + $0x20] sm:$0xff] %v454_v40 }
  0xd8   : >> { %s461_s28 = scalar_lea.vmem %s953_s7, %s459_s21 [#allocation2]   ;;  %s462_s18 = scalar_lea.vmem %s972_s11, %s459_s21  }
  0xda PF: > { %769 = sdivrem.u32 %s1038_s15, 5 }
  0xdb   : > { %s640_s24 = smul.u32 40, %s978_s23 }
  0xdd   : > { %s1010_s25 = scalar_lea.vmem %s953_s7, %s640_s24 [#allocation2]   ;;  %s469_s26 = scalar_lea.vmem %s972_s11, %s640_s24  }
  0xe3   : > { %s770_s27 = spop.drf %769 }
  0xe4   : > { %s771_s29 = spop.drf %769 }
  0xe5   : > { %p642_p13 = scmp.le.s32.totalorder %s771_s29, 0 }
  0xe6   : > { %s844_s30 = smov (!%p642_p13), %s469_s26   ;;  %s848_s5 = smov (!%p642_p13), %s1010_s25  }
  0xe7   : > { %560 = sbr.rel (%p642_p13) target bundleno = 244 (0xf4), region = 131  ;;  %s852_s6 = smov (!%p642_p13), 0  }
  0xe8   : > { %s856_s8 = smov (!%p642_p13), 0  }
  0xec LB: >> { %v479_v41 = vld [vmem:[%s850_s5] sm:$0xff]  ;;  %s481_s7 = sadd.s32 1, %s854_s6  ;;  %s473_s8 = sadd.s32 1, %s858_s8   ;;  %s858_s8 = sphi %s856_s8, %s473_s8   ;;  %s854_s6 = sphi %s852_s6, %s853_s6   ;;  %s850_s5 = sphi %s848_s5, %s486_s5   ;;  %s846_s30 = sphi %s844_s30, %s487_s30  }
  0xed   : >> { %480 = vst [vmem:[%s846_s30] sm:$0xff] %v479_v41  ;;  %p482_p0 = scmp.ge.s32.totalorder %s481_s7, %s771_s29  ;;  %p472_p1 = scmp.ge.s32.totalorder %s473_s8, %s771_s29 }
  0xef   : >> { %s1042_s7 = smov (%p482_p0, %s481_s7), 0  ;;  %475 = sbr.rel (!%p472_p1) target bundleno = 236 (0xec), region = 137 }
  0xf0   : >> { %s643_s15 = sshll.u32 %s1042_s7, 3  ;;  %s853_s6 = smov %s1042_s7  }
  0xf1   : >> { %s486_s5 = scalar_lea.vmem %s1010_s25, %s643_s15 [#allocation2]   ;;  %s487_s30 = scalar_lea.vmem %s469_s26, %s643_s15  }
  0xf4 PF: > { %p11_p2 = scmp.ge.s32.totalorder %s900_s19, 4   ;;  %s1034_s15 = smov %s822_s16 }
  0xf5   : > { %s1035_s16 = smov %s908_s22  ;;  %s1036_s17 = smov %s900_s19 }
  0xf6   :  { %13 = sbr.rel (!%p11_p2) target bundleno = 2 (0x2), region = 148 }

</bundles_post_ra>
